<compile_context>
chip_gen: v6e
topology: v6e:2x2x1
jax: 0.10.0
libtpu: 0.0.40
codegen_flags: <defaults>
</compile_context>

<pallas_src>
import functools

import jax
import jax.numpy as jnp
from jax import lax
from jax.experimental import pallas as pl
from jax.experimental.pallas import tpu as pltpu


def _tv_loss_kernel(masks_ref, x_ref, o_ref, *, W, t_scale):
    """One grid step = one batch-folded block.

    masks_ref : (2, T, HW) f32 resident block -- {0, 1/count_h} and {0, 1/count_w}
                masks, precomputed once in the wrapper (grid-invariant).
    x_ref     : (Bb, T, HW) input block in its native dtype (bf16 diffs stay bf16).
    o_ref     : (1, 8, 128) f32 lane-dense partial-sum slab for this block.
    """
    xd = x_ref[...]                          # (Bb, T, HW), native dtype
    mh = masks_ref[0]                        # (T, HW) -- broadcasts over the batch dim
    mw = masks_ref[1]

    # H / W neighbor diffs via lane rolls (XLU, off the VALU critical path).  Wrapped
    # columns are zeroed by the masks, which also carry the 1/count scales, so both
    # terms share one fused expression and one accumulator.
    dh = (xd - pltpu.roll(xd, shift=W, axis=2)).astype(jnp.float32)   # x[h] - x[h-1]
    dw = (xd - pltpu.roll(xd, shift=1, axis=2)).astype(jnp.float32)   # x[w] - x[w-1]
    sq = dh * dh * mh + dw * dw * mw                                  # (Bb, T, HW)
    total = jnp.sum(sq)

    # T diff: sublane slice (T is the sublane axis of the lane-dense block).  The
    # wrapper guarantees T >= 2 here (degenerate dims short-circuit to NaN).
    dt = (xd[:, 1:, :] - xd[:, :-1, :]).astype(jnp.float32)           # x[t] - x[t-1]
    total = total + jnp.sum(dt * dt) * t_scale

    # Lane-dense per-block partial: scalar at [0, 0], zeros elsewhere.  Final
    # cross-block (tree) sum and scaling happen in the JAX wrapper.
    row = lax.broadcasted_iota(jnp.int32, (8, 128), 0)
    col = lax.broadcasted_iota(jnp.int32, (8, 128), 1)
    o_ref[0] = jnp.where((row == 0) & (col == 0), total, jnp.float32(0.0))


def tv_loss(x, tv_weight=1.0):
    """Pallas TPU implementation of TVLoss.forward (returns a float32 scalar)."""
    B, T, H, W = x.shape
    HW = H * W

    # Static counts (match PyTorch _tensor_size on the slices).
    count_t = (T - 1) * H * W
    count_h = T * (H - 1) * W
    count_w = T * H * (W - 1)

    if count_t == 0 or count_h == 0 or count_w == 0:
        # Degenerate dim -> 0/0 in the PyTorch reference -> NaN.  Preserve that
        # semantics without poisoning the in-kernel masks with inf.
        return jnp.array(jnp.nan, dtype=jnp.float32)

    # Lane-dense layout: fold H*W onto the lane axis (free wrapper reshape).
    x2 = x.reshape(B, T, HW)

    # Grid-invariant {0, 1/count} masks, computed ONCE in the wrapper and passed as a
    # resident input block (constant index_map) instead of per-step iota/mask math.
    col = jnp.arange(HW, dtype=jnp.int32)[None, :]
    mask_h = jnp.broadcast_to(jnp.where(col >= W, 1.0 / count_h, 0.0), (T, HW))
    mask_w = jnp.broadcast_to(jnp.where(col % W != 0, 1.0 / count_w, 0.0), (T, HW))
    masks = jnp.stack([mask_h, mask_w]).astype(jnp.float32)           # (2, T, HW)

    # --- Block sizing: fold batch samples so each grid step moves ~2 MiB of input.
    itemsize = jnp.dtype(x.dtype).itemsize
    per_sample_bytes = T * HW * itemsize
    target_block_bytes = 2 * 2 ** 20
    Bb = max(1, min(B, target_block_bytes // max(1, per_sample_bytes)))

    # Per-generation VMEM budget with headroom (~48 MiB v7x, ~96 MiB v5e/v6e).
    try:
        phys_vmem = int(pltpu.get_tpu_info().vmem_capacity_bytes)
    except Exception:  # pragma: no cover - conservative fallback
        phys_vmem = 64 * 2 ** 20
    vmem_cap = (phys_vmem * 3) // 4

    def _vmem_estimate(bb):
        return (2 * bb * per_sample_bytes        # double-buffered input block
                + 2 * 2 * T * HW * 4             # resident masks
                + 10 * bb * T * HW * 4           # f32 diff / square temporaries
                + 2 * 8 * 128 * 4)               # output slab

    while Bb > 1 and _vmem_estimate(Bb) > vmem_cap:
        Bb = max(1, Bb // 2)

    num_blocks = pl.cdiv(B, Bb)
    B_pad = num_blocks * Bb
    if B_pad != B:
        # Zero-padded samples contribute exactly zero to every TV term.
        x2 = jnp.pad(x2, ((0, B_pad - B), (0, 0), (0, 0)))

    kernel = functools.partial(_tv_loss_kernel, W=W, t_scale=float(1.0 / count_t))

    partials = pl.pallas_call(
        kernel,
        out_shape=jax.ShapeDtypeStruct((num_blocks, 8, 128), jnp.float32),
        grid=(num_blocks,),
        in_specs=[
            pl.BlockSpec((2, T, HW), lambda g: (0, 0, 0)),    # resident masks
            pl.BlockSpec((Bb, T, HW), lambda g: (g, 0, 0)),   # batch-folded block
        ],
        out_specs=pl.BlockSpec((1, 8, 128), lambda g: (g, 0, 0)),
        compiler_params=pltpu.CompilerParams(
            # Per-block partials are independent -> parallel (2 TCs on v7x).
            dimension_semantics=("parallel",),
            vmem_limit_bytes=int(vmem_cap),
        ),
    )(masks, x2)

    total = jnp.sum(partials)                    # tree-style cross-block reduction
    return (tv_weight * 3.0 * total / B).astype(jnp.float32)


def tv_loss_ref(x, tv_weight=1.0):
    """Pure-JAX reference mirroring the PyTorch forward."""
    x = x.astype(jnp.float32)
    B, T, H, W = x.shape
    count_t = (T - 1) * H * W
    count_h = T * (H - 1) * W
    count_w = T * H * (W - 1)
    t_tv = jnp.sum((x[:, 1:, :, :] - x[:, :-1, :, :]) ** 2)
    h_tv = jnp.sum((x[:, :, 1:, :] - x[:, :, :-1, :]) ** 2)
    w_tv = jnp.sum((x[:, :, :, 1:] - x[:, :, :, :-1]) ** 2)
    return tv_weight * 3.0 * (h_tv / count_h + w_tv / count_w + t_tv / count_t) / B


if __name__ == "__main__":
    key = jax.random.PRNGKey(0)
    x = jax.random.normal(key, (2, 4, 16, 16), dtype=jnp.float32)

    out = jax.block_until_ready(tv_loss(x, tv_weight=1.0))
    ref = jax.block_until_ready(tv_loss_ref(x, tv_weight=1.0))

    assert jnp.allclose(out, ref, rtol=1e-5, atol=1e-5), (out, ref)
    print("KERNEL_OK")
</pallas_src>

<mosaic_0001>
module attributes {stable_mosaic.version = 11 : i64} {
  func.func @_tv_loss_kernel(%arg0: i32, %arg1: memref<2x4x256xf32, #tpu.memory_space<vmem>>, %arg2: memref<2x4x256xf32, #tpu.memory_space<vmem>>, %arg3: memref<1x8x128xf32, #tpu.memory_space<vmem>>) attributes {dimension_semantics = [#tpu.dimension_semantics<parallel>], iteration_bounds = array<i64: 1>, scalar_prefetch = 0 : i64, scratch_operands = 0 : i64, tpu.core_type = #tpu.core_type<tc>, window_params = [{pipeline_mode = #tpu.pipeline_mode<synchronous>, transform_indices = @transform_0, window_bounds = array<i64: 2, 4, 256>}, {transform_indices = @transform_1, window_bounds = array<i64: 2, 4, 256>}, {transform_indices = @transform_2, window_bounds = array<i64: 1, 8, 128>}]} {
    %c0 = arith.constant 0 : index
    %c0_0 = arith.constant 0 : index
    %c0_1 = arith.constant 0 : index
    %0 = vector.load %arg2[%c0, %c0_0, %c0_1] : memref<2x4x256xf32, #tpu.memory_space<vmem>>, vector<2x4x256xf32>
    %c0_2 = arith.constant 0 : index
    %c0_3 = arith.constant 0 : index
    %c0_4 = arith.constant 0 : index
    %1 = vector.load %arg1[%c0_2, %c0_3, %c0_4] : memref<2x4x256xf32, #tpu.memory_space<vmem>>, vector<1x4x256xf32>
    %2 = vector.shape_cast %1 : vector<1x4x256xf32> to vector<4x256xf32>
    %c1 = arith.constant 1 : index
    %c0_5 = arith.constant 0 : index
    %c0_6 = arith.constant 0 : index
    %3 = vector.load %arg1[%c1, %c0_5, %c0_6] : memref<2x4x256xf32, #tpu.memory_space<vmem>>, vector<1x4x256xf32>
    %4 = vector.shape_cast %3 : vector<1x4x256xf32> to vector<4x256xf32>
    %c16_i32 = arith.constant 16 : i32
    %5 = tpu.dynamic_rotate %0 by %c16_i32 dim 2 : vector<2x4x256xf32>, i32 -> vector<2x4x256xf32>
    %6 = arith.subf %0, %5 : vector<2x4x256xf32>
    %c1_i32 = arith.constant 1 : i32
    %7 = tpu.dynamic_rotate %0 by %c1_i32 dim 2 : vector<2x4x256xf32>, i32 -> vector<2x4x256xf32>
    %8 = arith.subf %0, %7 : vector<2x4x256xf32>
    %9 = arith.mulf %6, %6 : vector<2x4x256xf32>
    %10 = vector.shape_cast %2 : vector<4x256xf32> to vector<1x4x256xf32>
    %11 = vector.broadcast %10 : vector<1x4x256xf32> to vector<2x4x256xf32>
    %12 = arith.mulf %9, %11 : vector<2x4x256xf32>
    %13 = arith.mulf %8, %8 : vector<2x4x256xf32>
    %14 = vector.shape_cast %4 : vector<4x256xf32> to vector<1x4x256xf32>
    %15 = vector.broadcast %14 : vector<1x4x256xf32> to vector<2x4x256xf32>
    %16 = arith.mulf %13, %15 : vector<2x4x256xf32>
    %17 = arith.addf %12, %16 : vector<2x4x256xf32>
    %18 = vector.shape_cast %17 : vector<2x4x256xf32> to vector<1x2x4x256xf32>
    %cst = arith.constant dense<0.000000e+00> : vector<1xf32>
    %19 = vector.multi_reduction <add>, %18, %cst [1, 2, 3] : vector<1x2x4x256xf32> to vector<1xf32>
    %20 = vector.shape_cast %19 : vector<1xf32> to vector<1x1x1x1xf32>
    %21 = vector.extract %20[0, 0, 0, 0] : f32 from vector<1x1x1x1xf32>
    %22 = vector.extract_strided_slice %0 {offsets = [0, 1, 0], sizes = [2, 3, 256], strides = [1, 1, 1]} : vector<2x4x256xf32> to vector<2x3x256xf32>
    %23 = vector.extract_strided_slice %0 {offsets = [0, 0, 0], sizes = [2, 3, 256], strides = [1, 1, 1]} : vector<2x4x256xf32> to vector<2x3x256xf32>
    %24 = arith.subf %22, %23 : vector<2x3x256xf32>
    %25 = arith.mulf %24, %24 : vector<2x3x256xf32>
    %26 = vector.shape_cast %25 : vector<2x3x256xf32> to vector<1x2x3x256xf32>
    %cst_7 = arith.constant dense<0.000000e+00> : vector<1xf32>
    %27 = vector.multi_reduction <add>, %26, %cst_7 [1, 2, 3] : vector<1x2x3x256xf32> to vector<1xf32>
    %28 = vector.shape_cast %27 : vector<1xf32> to vector<1x1x1x1xf32>
    %29 = vector.extract %28[0, 0, 0, 0] : f32 from vector<1x1x1x1xf32>
    %cst_8 = arith.constant 0.00130208337 : f32
    %30 = arith.mulf %29, %cst_8 : f32
    %31 = arith.addf %21, %30 : f32
    %32 = tpu.iota {dimensions = array<i32: 0>} : vector<8x128xi32>
    %33 = tpu.iota {dimensions = array<i32: 1>} : vector<8x128xi32>
    %c0_i32 = arith.constant 0 : i32
    %34 = vector.broadcast %c0_i32 : i32 to vector<8x128xi32>
    %35 = arith.cmpi eq, %32, %34 : vector<8x128xi32>
    %c0_i32_9 = arith.constant 0 : i32
    %36 = vector.broadcast %c0_i32_9 : i32 to vector<8x128xi32>
    %37 = arith.cmpi eq, %33, %36 : vector<8x128xi32>
    %38 = arith.andi %35, %37 : vector<8x128xi1>
    %cst_10 = arith.constant 0.000000e+00 : f32
    %39 = vector.broadcast %31 : f32 to vector<8x128xf32>
    %40 = vector.broadcast %cst_10 : f32 to vector<8x128xf32>
    %41 = arith.select %38, %39, %40 : vector<8x128xi1>, vector<8x128xf32>
    %c0_11 = arith.constant 0 : index
    %c0_12 = arith.constant 0 : index
    %c0_13 = arith.constant 0 : index
    %42 = vector.load %arg3[%c0_11, %c0_12, %c0_13] : memref<1x8x128xf32, #tpu.memory_space<vmem>>, vector<1x8x128xf32>
    %43 = vector.shape_cast %42 : vector<1x8x128xf32> to vector<8x128xf32>
    %44 = vector.shape_cast %41 : vector<8x128xf32> to vector<1x8x128xf32>
    tpu.vector_store %arg3[%c0_11, %c0_12, %c0_13], %44 {strides = array<i32>} : memref<1x8x128xf32, #tpu.memory_space<vmem>>, vector<1x8x128xf32>,
    return
  }
  func.func @transform_0(%arg0: i32) -> (i32, i32, i32) {
    %c0_i32 = arith.constant 0 : i32
    %c0_i32_0 = arith.constant 0 : i32
    %c0_i32_1 = arith.constant 0 : i32
    %c0_i32_2 = arith.constant 0 : i32
    return %c0_i32, %c0_i32_0, %c0_i32_1 : i32, i32, i32
  }
  func.func @transform_1(%arg0: i32) -> (i32, i32, i32) {
    %c0_i32 = arith.constant 0 : i32
    %c0_i32_0 = arith.constant 0 : i32
    %c0_i32_1 = arith.constant 0 : i32
    return %arg0, %c0_i32, %c0_i32_0 : i32, i32, i32
  }
  func.func @transform_2(%arg0: i32) -> (i32, i32, i32) {
    %c0_i32 = arith.constant 0 : i32
    %c0_i32_0 = arith.constant 0 : i32
    %c0_i32_1 = arith.constant 0 : i32
    return %arg0, %c0_i32, %c0_i32_0 : i32, i32, i32
  }
}

</mosaic_0001>

<bundles_post_ra>
// kernel: tpu_custom_call.1
= control target key start
LH: loop header
LB: loop body
LE: loop exit
PB: predicated region body
PF: predicated region fallthrough
CT: control target
= control target key end

     0   :  { %7 = vsyncpa [#allocation3], 0  ;;  %s330_s0 = inlined_call_operand.hbm [shape: f32[2,4,256], index: 0, kind: input, shape index: {}]   ;;  %s331_s1 = inlined_call_operand.hbm [shape: f32[2,4,256], index: 1, kind: input, shape index: {}]   ;;  %s332_s2 = inlined_call_operand.hbm [shape: f32[1,8,128], index: 2, kind: output, shape index: {}]  }
   0x1   :  { %8 = vsyncpa [#allocation6], 0 }
   0x2   :  { %9 = vsyncpa [#allocation4], 0  ;;  %s274_s9 = smov [#allocation2]  }
   0x3   :  { %s15_s10 = sshll.u32 %s274_s9, 4  ;;  %s16_s10 = int_to_ptr.vmem [resolvable:$true] %s15_s10 }
   0x4   :  { %s216_s11 = scalar_lea.vmem %s16_s10, 256  ;;  %p221_p1 = scmp.lt.s32.totalorder %s16_s10, %s16_s10 }
   0x5   :  { %p217_p0 = scmp.ne.s32.totalorder %s16_s10, %s216_s11  ;;  %p222_p2 = scmp.lt.s32.totalorder %s216_s11, %s216_s11 }
   0x7   :  { %p223_p3 = por %p222_p2, %p221_p1 }
   0x9   :  { %p224_p4 = pnand %p223_p3, %p217_p0 }
   0xb   :  { %227 = shalt.err (!%p224_p4)
}
   0xc   :  { %s275_s12 = smov 128   ;;  %s276_s13 = smov 8  }
   0xd   :  { %21 = dma.hbm_to_vmem [thread:$0]  %s330_s0, 256, %s16_s10, [#allocation3], %s275_s12, %s275_s12, %s276_s13  }
   0xe   :  { %s277_s16 = smov [#allocation5]  }
   0xf   :  { %s27_s17 = sshll.u32 %s277_s16, 4  ;;  %s28_s17 = int_to_ptr.vmem [resolvable:$true] %s27_s17 }
  0x10   :  { %s236_s18 = scalar_lea.vmem %s28_s17, 256  ;;  %p241_p6 = scmp.lt.s32.totalorder %s28_s17, %s28_s17 }
  0x11   :  { %p237_p5 = scmp.ne.s32.totalorder %s28_s17, %s236_s18  ;;  %p242_p7 = scmp.lt.s32.totalorder %s236_s18, %s236_s18 }
  0x13   :  { %p243_p8 = por %p242_p7, %p241_p6 }
  0x15   :  { %p244_p9 = pnand %p243_p8, %p237_p5 }
  0x17   :  { %247 = shalt.err (!%p244_p9)
}
  0x18   :  { %33 = dma.hbm_to_vmem [thread:$0]  %s331_s1, 256, %s28_s17, [#allocation6], %s275_s12, %s275_s12, %s276_s13  }
  0x19   :  { %268 = dma.done.wait [#allocation3], 256  }
  0x1a   :  { %269 = vsyncadd [#allocation3], 4294967040 }
  0x1b   :  { %270 = dma.done.wait [#allocation6], 256  }
  0x1c   :  { %271 = vsyncadd [#allocation6], 4294967040  ;;  %v40_v0 = vld [vmem:[#allocation5] sm:$0xff]  ;;  %s278_s0 = smov 1   ;;  %s279_s21 = smov 16   ;;  %v302_v2 = vld [vmem:[#allocation5 + $0x8] sm:$0xff]  ;;  %v59_v23 = vlaneseq }
  0x1d   :  { %76 = vrot.lane.b32.xlu1 %v40_v0, %s278_s0  ;;  %51 = vrot.lane.b32.xlu0 %v40_v0, %s279_s21  ;;  %v47_v1 = vcombine.high %v40_v0, %v40_v0  ;;  %v48_v3 = vcombine.high %v302_v2, %v302_v2  ;;  %v132_v4 = vrot.slane %v40_v0, 7  ;;  %v133_v6 = vrot.slane %v302_v2, 7  ;;  %v44_v46 = vld [vmem:[#allocation2 + $0x8] sm:$0xff]  ;;  %v42_v47 = vld [vmem:[#allocation2] sm:$0xff]  ;;  %s280_s24 = smov [#allocation7]  }
  0x1e   :  { %vm152_vm0 = vcmask 1042432   ;;  %v311_v24 = vand.u32 127, %v59_v23  ;;  %vm115_vm3 = vcmask 1043456   ;;  %s185_s25 = sshll.u32 %s280_s24, 4  ;;  %s186_s25 = int_to_ptr.vmem [resolvable:$true] %s185_s25 }
  0x1f   :  { %v136_v5 = vsub.f32 %v40_v0, %v132_v4  ;;  %v137_v8 = vsub.f32 %v302_v2, %v133_v6  ;;  %s248_s27 = scalar_lea.vmem %s186_s25, 128  ;;  %p253_p11 = scmp.lt.s32.totalorder %s186_s25, %s186_s25 }
  0x20   :  { %vm84_vm1 = vcmp.lt.s32.totalorder %v311_v24, 1  ;;  %vm61_vm2 = vcmp.lt.s32.totalorder %v311_v24, 16  ;;  %vm174_vm5 = vcmp.eq.s32.totalorder %v311_v24, 0  ;;  %p249_p10 = scmp.ne.s32.totalorder %s186_s25, %s248_s27  ;;  %p254_p12 = scmp.lt.s32.totalorder %s248_s27, %s248_s27 }
  0x21   :  { %53 = vrot.lane.b32.xlu0 %v302_v2, %s279_s21  ;;  %80 = vrot.lane.b32.xlu1 %v47_v1, %s278_s0  ;;  %v138_v7 = vmul.f32 %v136_v5, %v136_v5  ;;  %v139_v10 = vmul.f32 %v137_v8, %v137_v8 }
  0x22   :  { %p255_p13 = por %p254_p12, %p253_p11 }
  0x23   :  { %v142_v9 = vcombine.high %v138_v7, %v138_v7  ;;  %v144_v11 = vrot.slane %v138_v7, 1  ;;  %v143_v13 = vcombine.high %v139_v10, %v139_v10  ;;  %v146_v14 = vrot.slane %v139_v10, 1 }
  0x24   :  { %p256_p0 = pnand %p255_p13, %p249_p10 }
  0x25   :  { %57 = vrot.lane.b32.xlu1 %v48_v3, %s279_s21  ;;  %55 = vrot.lane.b32.xlu0 %v47_v1, %s279_s21  ;;  %v145_v12 = vrot.slane %v142_v9, 1  ;;  %v153_v15 = vsel %vm152_vm0, %v144_v11, 0.0  ;;  %v147_v18 = vrot.slane %v143_v13, 1  ;;  %v156_v19 = vsel %vm152_vm0, %v146_v14, 0.0 }
  0x27   :  { %v154_v16 = vsel %vm152_vm0, %v145_v12, 0.0  ;;  %v158_v21 = vsel %vm152_vm0, %v147_v18, 0.0 }
  0x28   :  { %v155_v17 = vadd.f32 %v154_v16, %v153_v15 }
  0x29   :  { %82 = vrot.lane.b32.xlu1 %v48_v3, %s278_s0  ;;  %78 = vrot.lane.b32.xlu0 %v302_v2, %s278_s0 }
  0x2a   :  { %v157_v20 = vadd.f32 %v156_v19, %v155_v17 }
  0x2c   :  { %v159_v22 = vadd.f32 %v158_v21, %v157_v20  ;;  %v172_v20 = vshrl.u32 %v59_v23, 7 }
  0x2e   :  { %vm173_vm4 = vcmp.eq.s32.totalorder %v172_v20, 0 }
  0x2f   :  { %vm175_vm6 = vmand %vm173_vm4, %vm174_vm5 }
  0x4d   :  { %160 = vadd.xlane.f32.xlu1 %v159_v22 }
  0x8f   :  { %v77_v25 = vpop.permute.xlu1 %76  ;;  %v52_v26 = vpop.permute.xlu0 %51 }
  0x93   :  { %v54_v27 = vpop.permute.xlu0 %53  ;;  %v81_v28 = vpop.permute.xlu1 %80 }
  0x94   :  { %v85_v29 = vsel %vm84_vm1, %v77_v25, %v81_v28  ;;  %v87_v30 = vsel %vm84_vm1, %v81_v28, %v77_v25 }
  0x95   :  { %v93_v31 = vcombine.low %v87_v30, %v85_v29 }
  0x97   :  { %v97_v32 = vsub.f32 %v40_v0, %v93_v31  ;;  %v58_v33 = vpop.permute.xlu1 %57  ;;  %v56_v34 = vpop.permute.xlu0 %55 }
  0x98   :  { %v63_v35 = vsel %vm61_vm2, %v54_v27, %v58_v33  ;;  %v65_v36 = vsel %vm61_vm2, %v58_v33, %v54_v27  ;;  %v62_v37 = vsel %vm61_vm2, %v52_v26, %v56_v34  ;;  %v64_v38 = vsel %vm61_vm2, %v56_v34, %v52_v26 }
  0x99   :  { %v71_v39 = vcombine.low %v65_v36, %v63_v35  ;;  %v70_v40 = vcombine.low %v64_v38, %v62_v37  ;;  %v103_v41 = vmul.f32 %v97_v32, %v97_v32 }
  0x9b   :  { %v75_v42 = vsub.f32 %v302_v2, %v71_v39  ;;  %v74_v43 = vsub.f32 %v40_v0, %v70_v40  ;;  %v83_v44 = vpop.permute.xlu1 %82  ;;  %v79_v45 = vpop.permute.xlu0 %78  ;;  %v105_v52 = vmul.f32 %v103_v41, %v44_v46 }
  0x9c   :  { %v86_v48 = vsel %vm84_vm1, %v79_v45, %v83_v44  ;;  %v88_v49 = vsel %vm84_vm1, %v83_v44, %v79_v45 }
  0x9d   :  { %v99_v50 = vmul.f32 %v74_v43, %v74_v43  ;;  %v94_v51 = vcombine.low %v88_v49, %v86_v48  ;;  %v100_v53 = vmul.f32 %v75_v42, %v75_v42 }
  0x9f   :  { %v101_v54 = vmul.f32 %v99_v50, %v42_v47  ;;  %v98_v55 = vsub.f32 %v302_v2, %v94_v51  ;;  %v102_v58 = vmul.f32 %v100_v53, %v42_v47 }
  0xa1   :  { %v104_v56 = vmul.f32 %v98_v55, %v98_v55  ;;  %v107_v57 = vadd.f32 %v105_v52, %v101_v54 }
  0xa3   :  { %v106_v59 = vmul.f32 %v104_v56, %v44_v46  ;;  %v111_v60 = vcombine.high %v107_v57, %v107_v57  ;;  %v116_v62 = vsel %vm115_vm3, %v107_v57, 0.0 }
  0xa5   :  { %v108_v61 = vadd.f32 %v106_v59, %v102_v58  ;;  %v117_v63 = vsel %vm115_vm3, %v111_v60, 0.0 }
  0xa6   :  { %v118_v0 = vadd.f32 %v117_v63, %v116_v62 }
  0xa7   :  { %v112_v1 = vcombine.high %v108_v61, %v108_v61  ;;  %v119_v3 = vsel %vm115_vm3, %v108_v61, 0.0 }
  0xa8   :  { %v120_v4 = vadd.f32 %v119_v3, %v118_v0 }
  0xa9   :  { %v121_v5 = vsel %vm115_vm3, %v112_v1, 0.0 }
  0xaa   :  { %v122_v6 = vadd.f32 %v121_v5, %v120_v4 }
  0xac   :  { %123 = vadd.xlane.f32.xlu0 %v122_v6 }
  0xd6   :  { %v161_v7 = vpop.xlane.xlu1 %160 }
  0xd7   :  { %v162_v8 = vrot.slane %v161_v7, 4 }
  0xd9   :  { %v163_v9 = vadd.f32 %v162_v8, %v161_v7 }
  0xdb   :  { %v164_v2 = vrot.slane %v163_v9, 2 }
  0xdd   :  { %v165_v13 = vadd.f32 %v164_v2, %v163_v9 }
  0xdf   :  { %v166_v16 = vrot.slane %v165_v13, 1 }
  0xe1   :  { %v167_v19 = vadd.f32 %v166_v16, %v165_v13 }
 0x135   :  { %v124_v10 = vpop.xlane.xlu0 %123 }
 0x136   :  { %v125_v11 = vrot.slane %v124_v10, 4 }
 0x138   :  { %v126_v12 = vadd.f32 %v125_v11, %v124_v10 }
 0x13a   :  { %v127_v14 = vrot.slane %v126_v12, 2 }
 0x13c   :  { %v128_v15 = vadd.f32 %v127_v14, %v126_v12 }
 0x13e   :  { %v129_v17 = vrot.slane %v128_v15, 1 }
 0x140   :  { %v130_v18 = vadd.f32 %v129_v17, %v128_v15 }
 0x142   :  { %195 = vpush %v130_v18 }
 0x143   :  { %197 = vpush %v167_v19 }
 0x173   :  { %s196_s1 = spop %195 }
 0x174   :  { %s198_s22 = spop %197 }
 0x175   :  { %s169_s23 = smul.f32 0.0013020834, %s198_s22 }
 0x177   :  { %s170_s26 = sadd.f32 %s196_s1, %s169_s23 }
 0x179   :  { %v176_v21 = vstv %s170_s26 }
 0x17a   :  { %v177_v22 = vsel %vm175_vm6, %v176_v21, 0.0 }
 0x17b   :  { %178 = vst [vmem:[#allocation7] sm:$0xff] %v177_v22 }
 0x17c   :  { %259 = shalt.err (!%p256_p0)
}
 0x17d   :  { %188 = dma.vmem_to_hbm [thread:$0]  %s186_s25, 128, %s332_s2, [#allocation4]  }
 0x17e   :  { %272 = dma.done.wait [#allocation4], 128  }
 0x17f   :  { %273 = vsyncadd [#allocation4], 4294967168 }
 0x180   :  { %192 = vsyncpa [#allocation3], 1 }
 0x181   :  { %193 = vsyncpa [#allocation6], 1 }
 0x182   :  { %194 = vsyncpa [#allocation4], 1 }

</bundles_post_ra>
